<compile_context>
chip_gen: v7x
topology: tpu7x:2x2x1
jax: 0.10.0
libtpu: 0.0.40
codegen_flags: <defaults>
</compile_context>

<pallas_src>
import jax
import jax.numpy as jnp
from jax.experimental import pallas as pl
from jax.experimental.pallas import tpu as pltpu


def conv_gemm_kernel(p_ref, w_ref, b_ref, o_ref):
    """Per-image GEMM:  out[c, m] = sum_k w[c, k] * patches[k, m] + b[c].

    p_ref: (K, OHW)    im2col patches for one image (K = Cin*KH*KW)
    w_ref: (Cout, K)   flattened OIHW filter taps (resident across grid steps)
    b_ref: (Cout, 1)   bias column (resident)
    o_ref: (Cout, OHW) output slab, already in flattened-NCHW order
    """
    acc = jnp.dot(w_ref[...], p_ref[...], preferred_element_type=jnp.float32)
    o_ref[...] = (acc + b_ref[...]).astype(o_ref.dtype)


@jax.jit
def conv2d_pallas(x_nchw, w_oihw, bias):
    N, Cin, H, W = x_nchw.shape
    Cout, _, KH, KW = w_oihw.shape
    OH, OW = H - KH + 1, W - KW + 1
    K = Cin * KH * KW
    OHW = OH * OW

    # Single-op im2col: (N, Cin*KH*KW, OH, OW), taps ordered (Cin, KH, KW).
    patches = jax.lax.conv_general_dilated_patches(
        x_nchw, (KH, KW), (1, 1), "VALID").reshape(N, K, OHW)

    # Same (Cin, KH, KW) flattening for the OIHW weight; no transposes anywhere.
    w_flat = w_oihw.reshape(Cout, K)
    b_col = bias.reshape(Cout, 1)

    out = pl.pallas_call(
        conv_gemm_kernel,
        out_shape=jax.ShapeDtypeStruct((N, Cout, OHW), x_nchw.dtype),
        grid=(N,),
        in_specs=[
            pl.BlockSpec((None, K, OHW), lambda n: (n, 0, 0)),  # per-image patches
            pl.BlockSpec((Cout, K), lambda n: (0, 0)),          # resident weights
            pl.BlockSpec((Cout, 1), lambda n: (0, 0)),          # resident bias
        ],
        out_specs=pl.BlockSpec((None, Cout, OHW), lambda n: (n, 0, 0)),
        compiler_params=pltpu.CompilerParams(
            dimension_semantics=("parallel",)),
    )(patches, w_flat, b_col)

    # Already (N, Cout, OH*OW) == flattened NCHW; a reshape restores PyTorch layout.
    return out.reshape(N, Cout, OH, OW)


if __name__ == "__main__":
    key = jax.random.PRNGKey(0)
    kx, kw, kb = jax.random.split(key, 3)

    # Small shapes consistent with Conv2d(3, 32, 7): x is (N, 3, 16, 16).
    N, Cin, H, W = 2, 3, 16, 16
    Cout, KH, KW = 32, 7, 7

    x = jax.random.normal(kx, (N, Cin, H, W), dtype=jnp.float32)

    # Deterministic parameter init (PyTorch-style uniform(-1/sqrt(fan_in), ...)).
    fan_in = Cin * KH * KW
    bound = 1.0 / (fan_in ** 0.5)
    w = jax.random.uniform(kw, (Cout, Cin, KH, KW), jnp.float32, -bound, bound)
    b = jax.random.uniform(kb, (Cout,), jnp.float32, -bound, bound)

    out = jax.block_until_ready(conv2d_pallas(x, w, b))

    # Reference check against XLA's convolution (also guards the (Cin,KH,KW)
    # tap-ordering assumption of conv_general_dilated_patches).
    ref = jax.lax.conv_general_dilated(
        x, w, window_strides=(1, 1), padding="VALID",
        dimension_numbers=("NCHW", "OIHW", "NCHW")) + b.reshape(1, Cout, 1, 1)

    assert out.shape == (N, Cout, H - KH + 1, W - KW + 1), out.shape
    assert jnp.allclose(out, ref, atol=1e-4, rtol=1e-4), \
        float(jnp.max(jnp.abs(out - ref)))
    print("KERNEL_OK")
</pallas_src>

<mosaic_0001>
module attributes {stable_mosaic.version = 11 : i64} {
  func.func @conv_gemm_kernel(%arg0: i32, %arg1: memref<1x147x100xf32, #tpu.memory_space<vmem>>, %arg2: memref<32x147xf32, #tpu.memory_space<vmem>>, %arg3: memref<32x1xf32, #tpu.memory_space<vmem>>, %arg4: memref<1x32x100xf32, #tpu.memory_space<vmem>>) attributes {dimension_semantics = [#tpu.dimension_semantics<parallel>], iteration_bounds = array<i64: 2>, scalar_prefetch = 0 : i64, scratch_operands = 0 : i64, tpu.core_type = #tpu.core_type<tc>, window_params = [{transform_indices = @transform_0, window_bounds = array<i64: 1, 147, 100>}, {pipeline_mode = #tpu.pipeline_mode<synchronous>, transform_indices = @transform_1, window_bounds = array<i64: 32, 147>}, {pipeline_mode = #tpu.pipeline_mode<synchronous>, transform_indices = @transform_2, window_bounds = array<i64: 32, 1>}, {transform_indices = @transform_3, window_bounds = array<i64: 1, 32, 100>}]} {
    %c0 = arith.constant 0 : index
    %c0_0 = arith.constant 0 : index
    %0 = vector.load %arg2[%c0, %c0_0] : memref<32x147xf32, #tpu.memory_space<vmem>>, vector<32x147xf32>
    %c0_1 = arith.constant 0 : index
    %c0_2 = arith.constant 0 : index
    %c0_3 = arith.constant 0 : index
    %1 = vector.load %arg1[%c0_1, %c0_2, %c0_3] : memref<1x147x100xf32, #tpu.memory_space<vmem>>, vector<1x147x100xf32>
    %2 = vector.shape_cast %1 : vector<1x147x100xf32> to vector<147x100xf32>
    %cst = arith.constant dense<0.000000e+00> : vector<32x100xf32>
    %3 = tpu.matmul %0, %2, %cst {dimension_numbers = #tpu.dot_dimension_numbers<[1], [0], [0], [1], [0, 0, 1, 1], [], []>} : vector<32x147xf32>, vector<147x100xf32>, vector<32x100xf32> -> vector<32x100xf32>
    %c0_4 = arith.constant 0 : index
    %c0_5 = arith.constant 0 : index
    %4 = vector.load %arg3[%c0_4, %c0_5] : memref<32x1xf32, #tpu.memory_space<vmem>>, vector<32x1xf32>
    %5 = vector.broadcast %4 : vector<32x1xf32> to vector<32x100xf32>
    %6 = arith.addf %3, %5 : vector<32x100xf32>
    %c0_6 = arith.constant 0 : index
    %c0_7 = arith.constant 0 : index
    %c0_8 = arith.constant 0 : index
    %7 = vector.load %arg4[%c0_6, %c0_7, %c0_8] : memref<1x32x100xf32, #tpu.memory_space<vmem>>, vector<1x32x100xf32>
    %8 = vector.shape_cast %7 : vector<1x32x100xf32> to vector<32x100xf32>
    %9 = vector.shape_cast %6 : vector<32x100xf32> to vector<1x32x100xf32>
    tpu.vector_store %arg4[%c0_6, %c0_7, %c0_8], %9 {strides = array<i32>} : memref<1x32x100xf32, #tpu.memory_space<vmem>>, vector<1x32x100xf32>,
    return
  }
  func.func @transform_0(%arg0: i32) -> (i32, i32, i32) {
    %c0_i32 = arith.constant 0 : i32
    %c0_i32_0 = arith.constant 0 : i32
    %c0_i32_1 = arith.constant 0 : i32
    return %arg0, %c0_i32, %c0_i32_0 : i32, i32, i32
  }
  func.func @transform_1(%arg0: i32) -> (i32, i32) {
    %c0_i32 = arith.constant 0 : i32
    %c0_i32_0 = arith.constant 0 : i32
    %c0_i32_1 = arith.constant 0 : i32
    return %c0_i32, %c0_i32_0 : i32, i32
  }
  func.func @transform_2(%arg0: i32) -> (i32, i32) {
    %c0_i32 = arith.constant 0 : i32
    %c0_i32_0 = arith.constant 0 : i32
    %c0_i32_1 = arith.constant 0 : i32
    return %c0_i32, %c0_i32_0 : i32, i32
  }
  func.func @transform_3(%arg0: i32) -> (i32, i32, i32) {
    %c0_i32 = arith.constant 0 : i32
    %c0_i32_0 = arith.constant 0 : i32
    %c0_i32_1 = arith.constant 0 : i32
    return %arg0, %c0_i32, %c0_i32_0 : i32, i32, i32
  }
}

</mosaic_0001>

<bundles_post_ra>
// kernel: conv2d_pallas.1
= control target key start
LH: loop header
LB: loop body
LE: loop exit
PB: predicated region body
PF: predicated region fallthrough
CT: control target
= control target key end

     0   :  { %s492_s12 = smov 0   ;;  %s596_s0 = inlined_call_operand.vmem [shape: f32[2,147,100], index: 0, kind: input, shape index: {}]   ;;  %s597_s1 = inlined_call_operand.vmem [shape: f32[32,147], index: 1, kind: input, shape index: {}]   ;;  %s598_s2 = inlined_call_operand.vmem [shape: f32[32,1], index: 2, kind: input, shape index: {}]   ;;  %s599_s3 = inlined_call_operand.vmem [shape: f32[2,32,100], index: 3, kind: output, shape index: {}]  }
   0x1 LB: > { %s384_s13 = sadd.s32 4294967295, %s467_s12   ;;  %p388_p0 = scmp.ge.s32.totalorder %s467_s12, 1  ;;  %s467_s12 = sphi %s492_s12, %s13_s12  }
   0x2   : > { %p137_p1 = scmp.lt.s32.totalorder %s467_s12, 3 }
   0x4   : > { %p138_p2 = pnand %p388_p0, %p137_p1 }
   0x5   : > { %p161_p3 = scmp.lt.s32.totalorder (!%p138_p2), %s384_s13, 1  ;;  %v172_v0 = vld [vmem:[%s597_s1 + $0x8] sm:$0xff] (!%p138_p2)  ;;  %vm222_vm0 = vcmask (!%p138_p2), 154624   ;;  %v469_v1 = vmov (!%p138_p2), 0.0|0.0   ;;  %v470_v3 = vmov (!%p138_p2), 0   ;;  %v200_v4 = vld [vmem:[%s598_s2 + $0x10] sm:$0xff] (!%p138_p2) }
   0x6   : > { %141 = sbr.rel (%p138_p2) target bundleno = 276 (0x114), region = 32  ;;  %400 = vmatprep.subr.bf16.mxu0 (!%p138_p2), %v469_v1  ;;  %427 = vmatprep.subr.bf16.mxu1 (!%p138_p2), %v469_v1  ;;  %v176_v2 = vld [vmem:[%s597_s1 + $0x28] sm:$0xff] (!%p138_p2)  ;;  %v198_v5 = vld [vmem:[%s598_s2] sm:$0xff] (!%p138_p2)  ;;  %v201_v6 = vld [vmem:[%s598_s2 + $0x18] sm:$0xff] (!%p138_p2)  ;;  %v471_v35 = vmov (!%p138_p2), 0.0   ;;  %vm235_vm1 = vcmask (!%p138_p2), 1042432  }
   0x7   : > { %393 = vmatprep.mubr.msk.f32.mxu0 (!%p138_p2), %vm222_vm0, %v172_v0  ;;  %395 = vmatprep.mubr.msk.f32.mxu1 (!%p138_p2), %vm222_vm0, %v176_v2  ;;  %v199_v7 = vld [vmem:[%s598_s2 + $0x8] sm:$0xff] (!%p138_p2)  ;;  %v171_v37 = vld [vmem:[%s597_s1] sm:$0xff] (!%p138_p2)  ;;  %v174_v39 = vld [vmem:[%s597_s1 + $0x18] sm:$0xff] (!%p138_p2)  ;;  %vm324_vm2 = vcmask (!%p138_p2), 818176  }
   0x8   : > { %460 = vset.pattern.permute.xlu1 (!%p138_p2), %v470_v3  ;;  %459 = vset.pattern.permute.xlu0 (!%p138_p2), %v470_v3  ;;  %v175_v38 = vld [vmem:[%s597_s1 + $0x20] sm:$0xff] (!%p138_p2)  ;;  %v178_v40 = vld [vmem:[%s597_s1 + $0x38] sm:$0xff] (!%p138_p2)  ;;  %v173_v41 = vld [vmem:[%s597_s1 + $0x10] sm:$0xff] (!%p138_p2) }
   0x9   : > { %214 = vperm.xlu1 (!%p138_p2), %460, %v200_v4   ;;  %204 = vperm.xlu0 (!%p138_p2), %459, %v198_v5   ;;  %v177_v42 = vld [vmem:[%s597_s1 + $0x30] sm:$0xff] (!%p138_p2) }
   0xd   : > { %s601_s13 = smov (!%p161_p3, %s384_s13), 1  ;;  %219 = vperm.xlu1 %460, %v201_v6   ;;  %209 = vperm.xlu0 %459, %v199_v7  }
   0xe   : > { %s447_s22 = smul.u32 152, %s601_s13  ;;  %s399_s17 = sshll.u32 %s601_s13, 5 }
   0xf   : > { %s170_s20 = scalar_lea.vmem %s599_s3, %s399_s17 }
  0x10   : > { %s528_s29 = scalar_lea.vmem %s596_s0, %s447_s22 }
  0x11   : > { %v179_v8 = vld [vmem:[%s528_s29] sm:$0xff]  ;;  %v180_v9 = vld [vmem:[%s528_s29 + $0x8] sm:$0xff]  ;;  %v181_v10 = vld [vmem:[%s528_s29 + $0x10] sm:$0xff] }
  0x12   : > { %v401_v11 = vpack.c.bf16 %v180_v9, %v179_v8  ;;  %v182_v12 = vld [vmem:[%s528_s29 + $0x18] sm:$0xff]  ;;  %v183_v14 = vld [vmem:[%s528_s29 + $0x20] sm:$0xff]  ;;  %v184_v15 = vld [vmem:[%s528_s29 + $0x28] sm:$0xff] }
  0x13   : > { %v404_v13 = vpack.c.bf16 %v182_v12, %v181_v10  ;;  %v407_v16 = vpack.c.bf16 %v184_v15, %v183_v14  ;;  %v185_v17 = vld [vmem:[%s528_s29 + $0x30] sm:$0xff]  ;;  %v186_v18 = vld [vmem:[%s528_s29 + $0x38] sm:$0xff]  ;;  %v187_v20 = vld [vmem:[%s528_s29 + $0x40] sm:$0xff] }
  0x14   : > { %402 = vmatpush1.bf16.msra.mxu0 %v401_v11  ;;  %437 = vmatpush1.bf16.msra.mxu1 %v401_v11  ;;  %v410_v19 = vpack.c.bf16 %v186_v18, %v185_v17  ;;  %v188_v21 = vld [vmem:[%s528_s29 + $0x48] sm:$0xff]  ;;  %v189_v23 = vld [vmem:[%s528_s29 + $0x50] sm:$0xff]  ;;  %v190_v24 = vld [vmem:[%s528_s29 + $0x58] sm:$0xff] }
  0x15   : > { %403 = vmatprep.subr.bf16.mxu0 %v469_v1  ;;  %428 = vmatprep.subr.bf16.mxu1 %v469_v1  ;;  %v413_v22 = vpack.c.bf16 %v188_v21, %v187_v20  ;;  %v416_v25 = vpack.c.bf16 %v190_v24, %v189_v23  ;;  %v191_v26 = vld [vmem:[%s528_s29 + $0x60] sm:$0xff]  ;;  %v192_v27 = vld [vmem:[%s528_s29 + $0x68] sm:$0xff]  ;;  %v193_v29 = vld [vmem:[%s528_s29 + $0x70] sm:$0xff] }
  0x16   : > { %v419_v28 = vpack.c.bf16 %v192_v27, %v191_v26  ;;  %v194_v30 = vld [vmem:[%s528_s29 + $0x78] sm:$0xff]  ;;  %v195_v32 = vld [vmem:[%s528_s29 + $0x80] sm:$0xff]  ;;  %v196_v33 = vld [vmem:[%s528_s29 + $0x88] sm:$0xff] }
  0x17   : > { %v422_v31 = vpack.c.bf16 %v194_v30, %v193_v29  ;;  %v425_v34 = vpack.c.bf16 %v196_v33, %v195_v32  ;;  %v197_v36 = vld [vmem:[%s528_s29 + $0x90] sm:$0x7] }
  0x18   : > { %405 = vmatpush1.bf16.msra.mxu0 %v404_v13  ;;  %438 = vmatpush1.bf16.msra.mxu1 %v404_v13 }
  0x19   : > { %406 = vmatprep.subr.bf16.mxu0 %v469_v1  ;;  %429 = vmatprep.subr.bf16.mxu1 %v469_v1 }
  0x1c   : > { %408 = vmatpush1.bf16.msra.mxu0 %v407_v16  ;;  %439 = vmatpush1.bf16.msra.mxu1 %v407_v16 }
  0x1d   : > { %409 = vmatprep.subr.bf16.mxu0 %v469_v1  ;;  %430 = vmatprep.subr.bf16.mxu1 %v469_v1 }
  0x20   : > { %411 = vmatpush1.bf16.msra.mxu0 %v410_v19  ;;  %440 = vmatpush1.bf16.msra.mxu1 %v410_v19 }
  0x21   : > { %412 = vmatprep.subr.bf16.mxu0 %v469_v1  ;;  %431 = vmatprep.subr.bf16.mxu1 %v469_v1 }
  0x24   : > { %414 = vmatpush1.bf16.msra.mxu0 %v413_v22  ;;  %441 = vmatpush1.bf16.msra.mxu1 %v413_v22 }
  0x25   : > { %415 = vmatprep.subr.bf16.mxu0 %v469_v1  ;;  %432 = vmatprep.subr.bf16.mxu1 %v469_v1 }
  0x28   : > { %417 = vmatpush1.bf16.msra.mxu0 %v416_v25  ;;  %442 = vmatpush1.bf16.msra.mxu1 %v416_v25 }
  0x29   : > { %418 = vmatprep.subr.bf16.mxu0 %v469_v1  ;;  %433 = vmatprep.subr.bf16.mxu1 %v469_v1 }
  0x2c   : > { %420 = vmatpush1.bf16.msra.mxu0 %v419_v28  ;;  %443 = vmatpush1.bf16.msra.mxu1 %v419_v28 }
  0x2d   : > { %421 = vmatprep.subr.bf16.mxu0 %v469_v1  ;;  %434 = vmatprep.subr.bf16.mxu1 %v469_v1 }
  0x30   : > { %423 = vmatpush1.bf16.msra.mxu0 %v422_v31  ;;  %444 = vmatpush1.bf16.msra.mxu1 %v422_v31 }
  0x31   : > { %424 = vmatprep.subr.bf16.mxu0 %v469_v1  ;;  %435 = vmatprep.subr.bf16.mxu1 %v469_v1 }
  0x34   : > { %426 = vmatpush1.bf16.msra.mxu0 %v425_v34  ;;  %445 = vmatpush1.bf16.msra.mxu1 %v425_v34 }
  0x35   : > { %275 = vmatprep.subr.mxu0 %v471_v35  ;;  %436 = vmatprep.subr.mxu1 %v471_v35 }
  0x38   : > { %392 = vmatpush1.msk.msra.mxu0 %vm235_vm1, %v197_v36  ;;  %446 = vmatpush1.msk.msra.mxu1 %vm235_vm1, %v197_v36 }
  0x39   : > { %304 = vmatmul.mubr.f32.vlgmr.msra.gmra.mrb[0].mxu0 %v171_v37  ;;  %314 = vmatmul.mubr.f32.vlgmr.msra.gmra.mrb[0].mxu1 %v175_v38 }
  0x3a   : > { %394 = vmatprep.mubr.msk.f32.mxu0 %vm222_vm0, %v174_v39  ;;  %396 = vmatprep.mubr.msk.f32.mxu1 %vm222_vm0, %v178_v40 }
  0x3d   : > { %309 = vmatmul.mubr.f32.gmra.mrb[2].mxu0 %v173_v41  ;;  %319 = vmatmul.mubr.f32.gmra.mrb[2].mxu1 %v177_v42 }
  0x88   : > { %v215_v43 = vpop.permute.xlu1 %214  ;;  %v205_v44 = vpop.permute.xlu0 %204 }
  0x8c   : > { %v220_v51 = vpop.permute.xlu1 %219  ;;  %v210_v52 = vpop.permute.xlu0 %209 }
 0x10c   : > { %v305_v45 = vpop.f32.mrb[0].mxu0  ;;  %v315_v46 = vpop.f32.mrb[0].mxu1 }
 0x10d   : > { %v306_v47 = vadd.f32 %v305_v45, %v205_v44  ;;  %v316_v48 = vadd.f32 %v315_v46, %v215_v43  ;;  %v307_v49 = vpop.f32.mrb[1].mxu0  ;;  %v317_v50 = vpop.f32.mrb[1].mxu1 }
 0x10f   : > { %325 = vst.msk [vmem:[%s170_s20] sm:$0xff] %vm324_vm2, %v306_v47  ;;  %327 = vst.msk [vmem:[%s170_s20 + $0x10] sm:$0xff] %vm324_vm2, %v316_v48 }
 0x110   : > { %v310_v53 = vpop.f32.mrb[2].mxu0  ;;  %v320_v54 = vpop.f32.mrb[2].mxu1 }
 0x111   : > { %v311_v55 = vadd.f32 %v310_v53, %v210_v52  ;;  %v321_v56 = vadd.f32 %v320_v54, %v220_v51  ;;  %v312_v57 = vpop.f32.mrb[3].mxu0  ;;  %v322_v58 = vpop.f32.mrb[3].mxu1 }
 0x113   : > { %326 = vst.msk [vmem:[%s170_s20 + $0x8] sm:$0xff] %vm324_vm2, %v311_v55  ;;  %328 = vst.msk [vmem:[%s170_s20 + $0x18] sm:$0xff] %vm324_vm2, %v321_v56 }
 0x114 PF: > { %s13_s12 = sadd.s32 1, %s467_s12  }
 0x115   : > { %p10_p4 = scmp.ge.s32.totalorder %s13_s12, 4  }
 0x117   :  { %12 = sbr.rel (!%p10_p4) target bundleno = 1 (0x1), region = 62 }

</bundles_post_ra>
